<compile_context>
chip_gen: v5e
topology: v5e:2x2
jax: 0.10.0
libtpu: 0.0.40
codegen_flags: <defaults>
</compile_context>

<pallas_src>
import jax
import jax.numpy as jnp
from jax.experimental import pallas as pl
from jax.experimental.pallas import tpu as pltpu

LN_EPS = 1e-5


def _round_up(n, m):
    return ((n + m - 1) // m) * m


def add_norm_kernel(x_ref, w_ref, b_ref, g_ref, beta_ref, o_ref, acc_ref):
    # x_ref:    (tm, tk)  tile of flattened activations (native dtype)
    # w_ref:    (tk, H)   K-slice of W^T (native dtype)
    # b_ref:    (1, H)    linear bias
    # g_ref:    (1, H)    layernorm gamma
    # beta_ref: (1, H)    layernorm beta
    # acc_ref:  (tm, H)   f32 accumulator scratch (persists across the K axis)
    k = pl.program_id(1)

    @pl.when(k == 0)
    def _init():
        acc_ref[...] = jnp.zeros_like(acc_ref)

    # Native-dtype operands straight into the MXU; f32 accumulation.
    acc_ref[...] += jnp.dot(x_ref[...], w_ref[...],
                            preferred_element_type=jnp.float32)

    @pl.when(k == pl.num_programs(1) - 1)
    def _epilogue():
        # Linear bias + LayerNorm over the hidden (lane) axis, all in f32.
        y = acc_ref[...] + b_ref[...].astype(jnp.float32)
        mean = jnp.mean(y, axis=-1, keepdims=True)
        centered = y - mean
        var = jnp.mean(centered * centered, axis=-1, keepdims=True)
        normed = centered * jax.lax.rsqrt(var + LN_EPS)
        o_ref[...] = (normed * g_ref[...].astype(jnp.float32)
                      + beta_ref[...].astype(jnp.float32)).astype(o_ref.dtype)


def add_norm(x, w_t, b, gamma, beta, *, tm=None, tk=None):
    """x: (B, S, H).  w_t: (H, H) = W^T (y = x @ W^T + b).  b/gamma/beta: (H,)."""
    B, S, H = x.shape
    rows = B * S
    assert w_t.shape == (H, H)

    # ---- tile selection -------------------------------------------------
    # Row tile: large (512) for real shapes, full-row for small demos.
    # Multiple of 16 so both f32 (8-row) and bf16 (16-row) sublane packing fit.
    if tm is None:
        tm = 512 if rows >= 512 else _round_up(rows, 16)
    padded_rows = _round_up(rows, tm)
    assert tm % 8 == 0 or tm == padded_rows

    # Contraction tile: whole H when small; otherwise a 128-multiple slice of H
    # so the resident W^T block is bounded to (tk, H).
    if tk is None:
        tk = H
        if H > 1024 and H % 128 == 0:
            for cand in (1024, 512, 256, 128):
                if H % cand == 0:
                    tk = cand
                    break
    assert H % tk == 0

    nm = padded_rows // tm
    nk = H // tk

    # ---- operand shaping ------------------------------------------------
    x2 = x.reshape(rows, H)
    if padded_rows != rows:
        x2 = jnp.pad(x2, ((0, padded_rows - rows), (0, 0)))
    b2 = b.reshape(1, H)
    g2 = gamma.reshape(1, H)
    be2 = beta.reshape(1, H)

    cost = pl.CostEstimate(
        flops=2 * rows * H * H,
        transcendentals=rows,  # one rsqrt per row
        bytes_accessed=(x2.size * x2.dtype.itemsize
                        + w_t.size * w_t.dtype.itemsize
                        + padded_rows * H * x.dtype.itemsize
                        + 3 * H * 4),
    )

    out2 = pl.pallas_call(
        add_norm_kernel,
        out_shape=jax.ShapeDtypeStruct((padded_rows, H), x.dtype),
        grid_spec=pltpu.PrefetchScalarGridSpec(
            num_scalar_prefetch=0,
            grid=(nm, nk),
            in_specs=[
                pl.BlockSpec((tm, tk), lambda i, k: (i, k)),   # x tile
                pl.BlockSpec((tk, H), lambda i, k: (k, 0)),    # W^T K-slice
                pl.BlockSpec((1, H), lambda i, k: (0, 0)),     # bias
                pl.BlockSpec((1, H), lambda i, k: (0, 0)),     # gamma
                pl.BlockSpec((1, H), lambda i, k: (0, 0)),     # beta
            ],
            out_specs=pl.BlockSpec((tm, H), lambda i, k: (i, 0)),
            scratch_shapes=[pltpu.VMEM((tm, H), jnp.float32)],
        ),
        compiler_params=pltpu.CompilerParams(
            dimension_semantics=("parallel", "arbitrary"),
            vmem_limit_bytes=64 * 1024 * 1024,
        ),
        cost_estimate=cost,
    )(x2, w_t, b2, g2, be2)

    if padded_rows != rows:
        out2 = out2[:rows]
    return out2.reshape(B, S, H)


def reference(x, w_t, b, gamma, beta):
    y = jnp.einsum("bsh,hk->bsk", x, w_t) + b
    mean = jnp.mean(y, axis=-1, keepdims=True)
    var = jnp.mean((y - mean) ** 2, axis=-1, keepdims=True)
    return (y - mean) / jnp.sqrt(var + LN_EPS) * gamma + beta


if __name__ == "__main__":
    B, S, H = 2, 8, 32
    key = jax.random.PRNGKey(0)
    kx, kw, kb = jax.random.split(key, 3)

    x = jax.random.normal(kx, (B, S, H), dtype=jnp.float32)

    # Deterministic parameter init (PyTorch-like uniform(-1/sqrt(H), 1/sqrt(H))).
    bound = 1.0 / jnp.sqrt(jnp.float32(H))
    W = jax.random.uniform(kw, (H, H), jnp.float32, -bound, bound)   # (out, in)
    b = jax.random.uniform(kb, (H,), jnp.float32, -bound, bound)
    gamma = jnp.ones((H,), jnp.float32)   # LayerNorm default init
    beta = jnp.zeros((H,), jnp.float32)

    w_t = W.T  # kernel consumes W^T: y = x @ W^T + b

    # f32 path (matches the PyTorch module's default dtype).
    out = jax.block_until_ready(add_norm(x, w_t, b, gamma, beta))
    ref = reference(x, w_t, b, gamma, beta)
    assert jnp.allclose(out, ref, atol=1e-5, rtol=1e-5), (
        float(jnp.max(jnp.abs(out - ref))))

    # bf16 path: activations/weights go to the MXU at bf16 rate (no up-cast
    # before the dot); accumulation + LayerNorm stay f32.
    xb = x.astype(jnp.bfloat16)
    wb = w_t.astype(jnp.bfloat16)
    out_bf16 = jax.block_until_ready(add_norm(xb, wb, b, gamma, beta))
    ref_bf16 = reference(xb.astype(jnp.float32), wb.astype(jnp.float32),
                         b, gamma, beta)
    assert jnp.allclose(out_bf16.astype(jnp.float32), ref_bf16,
                        atol=3e-2, rtol=3e-2), (
        float(jnp.max(jnp.abs(out_bf16.astype(jnp.float32) - ref_bf16))))

    print("KERNEL_OK")
</pallas_src>

<mosaic_0001>
module attributes {stable_mosaic.version = 11 : i64} {
  func.func @add_norm_kernel(%arg0: i32, %arg1: i32, %arg2: memref<16x32xf32, #tpu.memory_space<vmem>>, %arg3: memref<32x32xf32, #tpu.memory_space<vmem>>, %arg4: memref<1x32xf32, #tpu.memory_space<vmem>>, %arg5: memref<1x32xf32, #tpu.memory_space<vmem>>, %arg6: memref<1x32xf32, #tpu.memory_space<vmem>>, %arg7: memref<16x32xf32, #tpu.memory_space<vmem>>, %arg8: memref<16x32xf32, #tpu.memory_space<vmem>>) attributes {dimension_semantics = [#tpu.dimension_semantics<parallel>, #tpu.dimension_semantics<arbitrary>], iteration_bounds = array<i64: 1, 1>, scalar_prefetch = 0 : i64, scratch_operands = 1 : i64, tpu.core_type = #tpu.core_type<tc>, window_params = [{transform_indices = @transform_0, window_bounds = array<i64: 16, 32>}, {transform_indices = @transform_1, window_bounds = array<i64: 32, 32>}, {pipeline_mode = #tpu.pipeline_mode<synchronous>, transform_indices = @transform_2, window_bounds = array<i64: 1, 32>}, {pipeline_mode = #tpu.pipeline_mode<synchronous>, transform_indices = @transform_3, window_bounds = array<i64: 1, 32>}, {pipeline_mode = #tpu.pipeline_mode<synchronous>, transform_indices = @transform_4, window_bounds = array<i64: 1, 32>}, {transform_indices = @transform_5, window_bounds = array<i64: 16, 32>}]} {
    %c0_i32 = arith.constant 0 : i32
    %0 = arith.cmpi eq, %arg1, %c0_i32 : i32
    %1 = arith.extui %0 : i1 to i32
    %c0_i32_0 = arith.constant 0 : i32
    %2 = arith.cmpi ne, %1, %c0_i32_0 : i32
    scf.if %2 {
      %cst_10 = arith.constant 0.000000e+00 : f32
      %12 = vector.broadcast %cst_10 : f32 to vector<16x32xf32>
      %c0_11 = arith.constant 0 : index
      %c0_12 = arith.constant 0 : index
      %13 = vector.load %arg8[%c0_11, %c0_12] : memref<16x32xf32, #tpu.memory_space<vmem>>, vector<16x32xf32>
      tpu.vector_store %arg8[%c0_11, %c0_12], %12 {strides = array<i32>} : memref<16x32xf32, #tpu.memory_space<vmem>>, vector<16x32xf32>,
    } else {
    }
    %c0 = arith.constant 0 : index
    %c0_1 = arith.constant 0 : index
    %3 = vector.load %arg8[%c0, %c0_1] : memref<16x32xf32, #tpu.memory_space<vmem>>, vector<16x32xf32>
    %c0_2 = arith.constant 0 : index
    %c0_3 = arith.constant 0 : index
    %4 = vector.load %arg2[%c0_2, %c0_3] : memref<16x32xf32, #tpu.memory_space<vmem>>, vector<16x32xf32>
    %c0_4 = arith.constant 0 : index
    %c0_5 = arith.constant 0 : index
    %5 = vector.load %arg3[%c0_4, %c0_5] : memref<32x32xf32, #tpu.memory_space<vmem>>, vector<32x32xf32>
    %cst = arith.constant dense<0.000000e+00> : vector<16x32xf32>
    %6 = tpu.matmul %4, %5, %cst {dimension_numbers = #tpu.dot_dimension_numbers<[1], [0], [0], [1], [0, 0, 1, 1], [], []>} : vector<16x32xf32>, vector<32x32xf32>, vector<16x32xf32> -> vector<16x32xf32>
    %7 = arith.addf %3, %6 : vector<16x32xf32>
    %c0_6 = arith.constant 0 : index
    %c0_7 = arith.constant 0 : index
    %8 = vector.load %arg8[%c0_6, %c0_7] : memref<16x32xf32, #tpu.memory_space<vmem>>, vector<16x32xf32>
    tpu.vector_store %arg8[%c0_6, %c0_7], %7 {strides = array<i32>} : memref<16x32xf32, #tpu.memory_space<vmem>>, vector<16x32xf32>,
    %c0_i32_8 = arith.constant 0 : i32
    %9 = arith.cmpi eq, %arg1, %c0_i32_8 : i32
    %10 = arith.extui %9 : i1 to i32
    %c0_i32_9 = arith.constant 0 : i32
    %11 = arith.cmpi ne, %10, %c0_i32_9 : i32
    scf.if %11 {
      %c0_10 = arith.constant 0 : index
      %c0_11 = arith.constant 0 : index
      %12 = vector.load %arg8[%c0_10, %c0_11] : memref<16x32xf32, #tpu.memory_space<vmem>>, vector<16x32xf32>
      %c0_12 = arith.constant 0 : index
      %c0_13 = arith.constant 0 : index
      %13 = vector.load %arg4[%c0_12, %c0_13] : memref<1x32xf32, #tpu.memory_space<vmem>>, vector<1x32xf32>
      %14 = vector.broadcast %13 : vector<1x32xf32> to vector<16x32xf32>
      %15 = arith.addf %12, %14 : vector<16x32xf32>
      %cst_14 = arith.constant dense<0.000000e+00> : vector<16xf32>
      %16 = vector.multi_reduction <add>, %15, %cst_14 [1] : vector<16x32xf32> to vector<16xf32>
      %17 = vector.shape_cast %16 : vector<16xf32> to vector<16x1xf32>
      %cst_15 = arith.constant 3.200000e+01 : f32
      %18 = vector.broadcast %cst_15 : f32 to vector<16x1xf32>
      %19 = arith.divf %17, %18 : vector<16x1xf32>
      %20 = vector.broadcast %19 : vector<16x1xf32> to vector<16x32xf32>
      %21 = arith.subf %15, %20 : vector<16x32xf32>
      %22 = arith.mulf %21, %21 : vector<16x32xf32>
      %cst_16 = arith.constant dense<0.000000e+00> : vector<16xf32>
      %23 = vector.multi_reduction <add>, %22, %cst_16 [1] : vector<16x32xf32> to vector<16xf32>
      %24 = vector.shape_cast %23 : vector<16xf32> to vector<16x1xf32>
      %cst_17 = arith.constant 3.200000e+01 : f32
      %25 = vector.broadcast %cst_17 : f32 to vector<16x1xf32>
      %26 = arith.divf %24, %25 : vector<16x1xf32>
      %cst_18 = arith.constant 9.99999974E-6 : f32
      %27 = vector.broadcast %cst_18 : f32 to vector<16x1xf32>
      %28 = arith.addf %26, %27 : vector<16x1xf32>
      %29 = math.rsqrt %28 : vector<16x1xf32>
      %30 = vector.broadcast %29 : vector<16x1xf32> to vector<16x32xf32>
      %31 = arith.mulf %21, %30 : vector<16x32xf32>
      %c0_19 = arith.constant 0 : index
      %c0_20 = arith.constant 0 : index
      %32 = vector.load %arg5[%c0_19, %c0_20] : memref<1x32xf32, #tpu.memory_space<vmem>>, vector<1x32xf32>
      %33 = vector.broadcast %32 : vector<1x32xf32> to vector<16x32xf32>
      %34 = arith.mulf %31, %33 : vector<16x32xf32>
      %c0_21 = arith.constant 0 : index
      %c0_22 = arith.constant 0 : index
      %35 = vector.load %arg6[%c0_21, %c0_22] : memref<1x32xf32, #tpu.memory_space<vmem>>, vector<1x32xf32>
      %36 = vector.broadcast %35 : vector<1x32xf32> to vector<16x32xf32>
      %37 = arith.addf %34, %36 : vector<16x32xf32>
      %c0_23 = arith.constant 0 : index
      %c0_24 = arith.constant 0 : index
      %38 = vector.load %arg7[%c0_23, %c0_24] : memref<16x32xf32, #tpu.memory_space<vmem>>, vector<16x32xf32>
      tpu.vector_store %arg7[%c0_23, %c0_24], %37 {strides = array<i32>} : memref<16x32xf32, #tpu.memory_space<vmem>>, vector<16x32xf32>,
    } else {
    }
    return
  }
  func.func @transform_0(%arg0: i32, %arg1: i32) -> (i32, i32) {
    %c0_i32 = arith.constant 0 : i32
    return %arg0, %arg1 : i32, i32
  }
  func.func @transform_1(%arg0: i32, %arg1: i32) -> (i32, i32) {
    %c0_i32 = arith.constant 0 : i32
    %c0_i32_0 = arith.constant 0 : i32
    return %arg1, %c0_i32 : i32, i32
  }
  func.func @transform_2(%arg0: i32, %arg1: i32) -> (i32, i32) {
    %c0_i32 = arith.constant 0 : i32
    %c0_i32_0 = arith.constant 0 : i32
    %c0_i32_1 = arith.constant 0 : i32
    return %c0_i32, %c0_i32_0 : i32, i32
  }
  func.func @transform_3(%arg0: i32, %arg1: i32) -> (i32, i32) {
    %c0_i32 = arith.constant 0 : i32
    %c0_i32_0 = arith.constant 0 : i32
    %c0_i32_1 = arith.constant 0 : i32
    return %c0_i32, %c0_i32_0 : i32, i32
  }
  func.func @transform_4(%arg0: i32, %arg1: i32) -> (i32, i32) {
    %c0_i32 = arith.constant 0 : i32
    %c0_i32_0 = arith.constant 0 : i32
    %c0_i32_1 = arith.constant 0 : i32
    return %c0_i32, %c0_i32_0 : i32, i32
  }
  func.func @transform_5(%arg0: i32, %arg1: i32) -> (i32, i32) {
    %c0_i32 = arith.constant 0 : i32
    %c0_i32_0 = arith.constant 0 : i32
    return %arg0, %c0_i32 : i32, i32
  }
}

</mosaic_0001>

<bundles_post_ra>
// kernel: tpu_custom_call.1
= control target key start
LH: loop header
LB: loop body
LE: loop exit
PB: predicated region body
PF: predicated region fallthrough
CT: control target
= control target key end

     0   :  { %10 = vsyncpa [#allocation4], 0  ;;  %s374_s0 = inlined_call_operand.hbm [shape: f32[16,32], index: 0, kind: input, shape index: {}]   ;;  %s375_s1 = inlined_call_operand.hbm [shape: f32[32,32], index: 1, kind: input, shape index: {}]   ;;  %s376_s2 = inlined_call_operand.vmem [shape: f32[1,32], index: 2, kind: input, shape index: {}]   ;;  %s377_s3 = inlined_call_operand.vmem [shape: f32[1,32], index: 3, kind: input, shape index: {}]   ;;  %s378_s4 = inlined_call_operand.vmem [shape: f32[1,32], index: 4, kind: input, shape index: {}]   ;;  %s379_s5 = inlined_call_operand.hbm [shape: f32[16,32], index: 5, kind: output, shape index: {}]  }
   0x1   :  { %11 = vsyncpa [#allocation7], 0 }
   0x2   :  { %12 = vsyncpa [#allocation5], 0  ;;  %s17_s20 = sshll.u32 %s374_s0, 4  ;;  %s298_s21 = smov [#allocation3]   ;;  %s18_s20 = int_to_ptr.hbm [resolvable:$true] %s17_s20 }
   0x3   :  { %s19_s22 = sshll.u32 %s298_s21, 4  ;;  %s30_s25 = sshll.u32 %s375_s1, 4  ;;  %s20_s22 = int_to_ptr.vmem [resolvable:$true] %s19_s22  ;;  %s31_s25 = int_to_ptr.hbm [resolvable:$true] %s30_s25 }
   0x4   :  { %s299_s26 = smov 128   ;;  %s300_s27 = smov 8  }
   0x5   :  { %25 = dma.hbm_to_vmem [thread:$0]  %s18_s20, 256, %s20_s22, [#allocation4], %s299_s26, %s299_s26, %s300_s27  }
   0x6   :  { %s301_s28 = smov [#allocation6]  }
   0x7   :  { %s32_s29 = sshll.u32 %s301_s28, 4  ;;  %s33_s29 = int_to_ptr.vmem [resolvable:$true] %s32_s29 }
   0x8   :  { %38 = dma.hbm_to_vmem [thread:$0]  %s31_s25, 512, %s33_s29, [#allocation7], %s299_s26, %s299_s26, %s300_s27  }
   0x9   :  { %292 = dma.done.wait [#allocation4], 256  }
   0xa   :  { %293 = vsyncadd [#allocation4], 4294967040 }
   0xb   :  { %294 = dma.done.wait [#allocation7], 512  }
   0xc   :  { %295 = vsyncadd [#allocation7], 4294966784  ;;  %vm57_vm0 = vcmask 261120   ;;  %v302_v0 = vmov 0.0   ;;  %v67_v1 = vld [vmem:[#allocation6 + $0x18] sm:$0xff]  ;;  %v66_v2 = vld [vmem:[#allocation6 + $0x10] sm:$0xff] }
   0xd   :  { %58 = vst.msk [vmem:[#allocation2] sm:$0xff] %vm57_vm0, %v302_v0  ;;  %87 = vmatpush.msra.mxu0 %v67_v1  ;;  %200 = vmatpush.msra.mxu1 %v67_v1  ;;  %v65_v3 = vld [vmem:[#allocation6 + $0x8] sm:$0xff]  ;;  %v64_v4 = vld [vmem:[#allocation6] sm:$0xff]  ;;  %v62_v5 = vld [vmem:[#allocation3] sm:$0xff]  ;;  %v303_v20 = vmov 32.0   ;;  %s184_s11 = sshll.u32 %s379_s5, 4  ;;  %s185_s11 = int_to_ptr.hbm [resolvable:$true] %s184_s11 }
   0xe   :  { %59 = vst.msk [vmem:[#allocation2 + $0x8] sm:$0xff] %vm57_vm0, %v302_v0  ;;  %v63_v6 = vld [vmem:[#allocation3 + $0x8] sm:$0xff]  ;;  %v211_v13 = vld [vmem:[%s376_s2] ss:$0 sm:$0xff]  ;;  %214 = vrcp.f32 %v303_v20 }
   0xf   :  { %88 = vmatpush.msra.mxu0 %v66_v2  ;;  %201 = vmatpush.msra.mxu1 %v66_v2  ;;  %v212_v51 = vld [vmem:[%s377_s3] ss:$0 sm:$0xff]  ;;  %s304_s3 = smov [#allocation8]  }
  0x10   :  { %v213_v55 = vld [vmem:[%s378_s4] ss:$0 sm:$0xff]  ;;  %s182_s8 = sshll.u32 %s304_s3, 4  ;;  %s183_s8 = int_to_ptr.vmem [resolvable:$true] %s182_s8 }
  0x11   :  { %89 = vmatpush.msra.mxu0 %v65_v3  ;;  %202 = vmatpush.msra.mxu1 %v65_v3 }
  0x13   :  { %90 = vmatpush.msra.mxu0 %v64_v4  ;;  %203 = vmatpush.msra.mxu1 %v64_v4 }
  0x14   :  { %198 = vmatmul.msk.f32.vlgmr.msra.gmra.mxu0 %vm57_vm0, %v62_v5  ;;  %199 = vmatmul.msk.f32.vlgmr.msra.gmra.mxu1 %vm57_vm0, %v63_v6  ;;  %v60_v7 = vld [vmem:[#allocation2] sm:$0xff]  ;;  %v215_v21 = vpop.eup %214 }
  0x15   :  { %v61_v8 = vld [vmem:[#allocation2 + $0x8] sm:$0xff]  ;;  %v120_v22 = vmul.f32 32.0, %v215_v21  ;;  %vm124_vm1 = vweird.f32 %v215_v21 }
  0x17   :  { %v121_v23 = vsub.f32 1.0, %v120_v22 }
  0x19   :  { %v122_v24 = vmul.f32 %v215_v21, %v121_v23 }
  0x1b   :  { %v123_v25 = vadd.f32 %v215_v21, %v122_v24 }
  0x1d   :  { %v125_v26 = vsel %vm124_vm1, %v215_v21, %v123_v25 }
  0x91   :  { %v92_v9 = vpop.f32.mrf.mxu0  ;;  %v95_v10 = vpop.f32.mrf.mxu1 }
  0x92   :  { %v98_v11 = vadd.f32 %v92_v9, %v60_v7  ;;  %v99_v12 = vadd.f32 %v95_v10, %v61_v8 }
  0x94   :  { %100 = vst.msk [vmem:[#allocation2] sm:$0xff] %vm57_vm0, %v98_v11 }
  0x95   :  { %101 = vst.msk [vmem:[#allocation2 + $0x8] sm:$0xff] %vm57_vm0, %v99_v12 }
  0x9b   :  { %v105_v14 = vld [vmem:[#allocation2] sm:$0xff] }
  0x9c   :  { %v111_v15 = vadd.f32 %v211_v13, %v105_v14  ;;  %v106_v16 = vld [vmem:[#allocation2 + $0x8] sm:$0xff] }
  0x9d   :  { %v112_v18 = vadd.f32 %v211_v13, %v106_v16 }
  0x9e   :  { %v113_v17 = vsel %vm57_vm0, %v111_v15, 0.0 }
  0x9f   :  { %114 = vadd.xlane.f32.xlu0 %v113_v17  ;;  %v116_v19 = vsel %vm57_vm0, %v112_v18, 0.0 }
  0xa7   :  { %117 = vadd.xlane.f32.xlu0 %v116_v19 }
 0x112   :  { %v115_v27 = vpop.xlane.xlu0 %114 }
 0x113   :  { %v126_v28 = vmul.f32 %v125_v26, %v115_v27 }
 0x115   :  { %v128_v29 = vsub.f32 %v111_v15, %v126_v28 }
 0x117   :  { %v130_v30 = vmul.f32 %v128_v29, %v128_v29 }
 0x119   :  { %v132_v31 = vsel %vm57_vm0, %v130_v30, 0.0 }
 0x11a   :  { %133 = vadd.xlane.f32.xlu1 %v132_v31  ;;  %v118_v32 = vpop.xlane.xlu0 %117 }
 0x11b   :  { %v127_v33 = vmul.f32 %v125_v26, %v118_v32 }
 0x11d   :  { %v129_v34 = vsub.f32 %v112_v18, %v127_v33 }
 0x11f   :  { %v131_v35 = vmul.f32 %v129_v34, %v129_v34 }
 0x121   :  { %v135_v36 = vsel %vm57_vm0, %v131_v35, 0.0 }
 0x122   :  { %136 = vadd.xlane.f32.xlu1 %v135_v36 }
 0x18d   :  { %v134_v37 = vpop.xlane.xlu1 %133 }
 0x18e   :  { %v138_v38 = vmul.f32 %v134_v37, %v125_v26 }
 0x190   :  { %v140_v39 = vadd.f32 1e-05, %v138_v38 }
 0x192   :  { %216 = vrsqrt.f32 %v140_v39  ;;  %vm148_vm3 = vweird.f32 %v140_v39 }
 0x195   :  { %v137_v40 = vpop.xlane.xlu1 %136 }
 0x196   :  { %v139_v41 = vmul.f32 %v137_v40, %v125_v26 }
 0x198   :  { %v217_v42 = vpop.eup %216  ;;  %v141_v43 = vadd.f32 1e-05, %v139_v41 }
 0x199   :  { %v143_v44 = vmul.f32 %v217_v42, %v140_v39  ;;  %vm149_vm2 = vweird.f32 %v217_v42 }
 0x19a   :  { %218 = vrsqrt.f32 %v141_v43  ;;  %vm150_vm4 = vmor %vm148_vm3, %vm149_vm2  ;;  %vm158_vm6 = vweird.f32 %v141_v43 }
 0x19b   :  { %v144_v45 = vmul.f32 %v217_v42, %v143_v44 }
 0x19d   :  { %v145_v46 = vmul.f32 0.5, %v144_v45 }
 0x19f   :  { %v146_v47 = vsub.f32 1.5, %v145_v46 }
 0x1a0   :  { %v219_v48 = vpop.eup %218 }
 0x1a1   :  { %v147_v49 = vmul.f32 %v217_v42, %v146_v47  ;;  %v153_v50 = vmul.f32 %v219_v48, %v141_v43  ;;  %vm159_vm5 = vweird.f32 %v219_v48 }
 0x1a2   :  { %vm160_vm7 = vmor %vm158_vm6, %vm159_vm5 }
 0x1a3   :  { %v151_v52 = vsel %vm150_vm4, %v217_v42, %v147_v49  ;;  %v154_v53 = vmul.f32 %v219_v48, %v153_v50 }
 0x1a4   :  { %v162_v54 = vmul.f32 %v151_v52, %v128_v29 }
 0x1a5   :  { %v155_v56 = vmul.f32 0.5, %v154_v53 }
 0x1a6   :  { %v168_v57 = vmul.f32 %v212_v51, %v162_v54 }
 0x1a7   :  { %v156_v58 = vsub.f32 1.5, %v155_v56 }
 0x1a8   :  { %v174_v59 = vadd.f32 %v213_v55, %v168_v57 }
 0x1a9   :  { %v157_v60 = vmul.f32 %v219_v48, %v156_v58 }
 0x1aa   :  { %176 = vst.msk [vmem:[#allocation8] sm:$0xff] %vm57_vm0, %v174_v59 }
 0x1ab   :  { %v161_v61 = vsel %vm160_vm7, %v219_v48, %v157_v60 }
 0x1ac   :  { %v163_v62 = vmul.f32 %v161_v61, %v129_v34 }
 0x1ae   :  { %v169_v63 = vmul.f32 %v212_v51, %v163_v62 }
 0x1b0   :  { %v175_v0 = vadd.f32 %v213_v55, %v169_v63 }
 0x1b2   :  { %177 = vst.msk [vmem:[#allocation8 + $0x8] sm:$0xff] %vm57_vm0, %v175_v0 }
 0x1b3   :  { %190 = dma.vmem_to_hbm [thread:$0]  %s183_s8, 256, %s185_s11, [#allocation5], %s299_s26, %s299_s26, %s300_s27  }
 0x1b4   :  { %296 = dma.done.wait [#allocation5], 256  }
 0x1b5   :  { %297 = vsyncadd [#allocation5], 4294967040 }
 0x1b6   :  { %195 = vsyncpa [#allocation4], 1 }
 0x1b7   :  { %196 = vsyncpa [#allocation7], 1 }
 0x1b8   :  { %197 = vsyncpa [#allocation5], 1 }

</bundles_post_ra>
